<compile_context>
chip_gen: v7x
topology: tpu7x:2x2x1
jax: 0.10.0
libtpu: 0.0.40
codegen_flags: <defaults>
</compile_context>

<pallas_src>
import functools

import jax
import jax.numpy as jnp
import numpy as np
from jax import lax
from jax.experimental import pallas as pl
from jax.experimental.pallas import tpu as pltpu


def _conv_layer_kernel(x_ref, w_ref, p_ref, o_ref, *,
                       dilation, w_pad, w_out, h_out, tile_m, n_chunks,
                       instance_norm, relu, eps):
    """One grid step == (one batch element) x (one C_out block).

    x_ref : (C_in_p, L)            reflection-padded flat image (compute dtype)
    w_ref : (co_blk, 9*C_in_p)     fused conv weight (compute dtype)
    p_ref : (co_blk, 3)            packed [bias, gamma, beta] (f32)
    o_ref : (co_blk, n_chunks*tile_m)  lane-dense padded output slab
    """
    co_blk = o_ref.shape[0]
    m_total = h_out * w_pad                       # valid (incl. wrap cols) lanes
    inv_cnt = 1.0 / float(h_out * w_out)          # IN divisor = H*W, not H*W_pad

    w = w_ref[...]                                # resident (co_blk, 9*C_in_p)
    tap_off = [(kh * w_pad + kw) * dilation for kh in range(3) for kw in range(3)]

    def conv_chunk(m0):
        # im2col patch for this lane chunk: 9 lane-shifted slices stacked along
        # the contraction axis -> one fused MXU GEMM with K = 9*C_in_p.
        pieces = [x_ref[:, pl.ds(m0 + s, tile_m)] for s in tap_off]
        patch = jnp.concatenate(pieces, axis=0)   # (9*C_in_p, tile_m)
        return jnp.dot(w, patch, preferred_element_type=jnp.float32)

    def valid_mask(m0):
        # Valid lanes: inside the image and not one of the 2*dilation
        # wrap-around columns of each output row.
        f = m0 + lax.broadcasted_iota(jnp.int32, (1, tile_m), 1)
        return jnp.logical_and(f < m_total, (f % w_pad) < w_out)

    def leaky(r):
        return jnp.maximum(r, 0.2 * r) if relu else r

    if not instance_norm:
        bias = p_ref[:, 0:1]

        if n_chunks == 1:
            o_ref[...] = leaky(conv_chunk(0) + bias).astype(o_ref.dtype)
            return

        def store_chunk(ci, _):
            m0 = pl.multiple_of(ci * tile_m, 128)
            o_ref[:, pl.ds(m0, tile_m)] = (
                leaky(conv_chunk(m0) + bias).astype(o_ref.dtype))
            return 0

        lax.fori_loop(0, n_chunks, store_chunk, 0, unroll=n_chunks <= 4)
        return

    # --- instance norm path ------------------------------------------------
    # NOTE: the conv bias is skipped entirely; IN's mean subtraction cancels any
    # per-channel constant, so adding it would just be a wasted VPU pass.
    gamma = p_ref[:, 1:2]
    beta = p_ref[:, 2:3]

    if n_chunks == 1:
        acc = conv_chunk(0)                        # (co_blk, tile_m) f32
        accm = jnp.where(valid_mask(0), acc, 0.0)
        mean = jnp.sum(accm, axis=-1, keepdims=True) * inv_cnt
        ex2 = jnp.sum(accm * accm, axis=-1, keepdims=True) * inv_cnt
        var = jnp.maximum(ex2 - mean * mean, 0.0)
        scale = gamma * lax.rsqrt(var + eps)
        shift = beta - mean * scale
        o_ref[...] = leaky(acc * scale + shift).astype(o_ref.dtype)
        return

    # Pass 1: conv each chunk, stash the raw result in the (VMEM-resident)
    # output block and accumulate masked sum / sum-of-squares.
    def pass1(ci, carry):
        s_acc, ss_acc = carry
        m0 = pl.multiple_of(ci * tile_m, 128)
        acc = conv_chunk(m0)
        o_ref[:, pl.ds(m0, tile_m)] = acc.astype(o_ref.dtype)
        accm = jnp.where(valid_mask(m0), acc, 0.0)
        return (s_acc + jnp.sum(accm, axis=-1, keepdims=True),
                ss_acc + jnp.sum(accm * accm, axis=-1, keepdims=True))

    zeros = jnp.zeros((co_blk, 1), jnp.float32)
    s_tot, ss_tot = lax.fori_loop(0, n_chunks, pass1, (zeros, zeros),
                                  unroll=n_chunks <= 4)
    mean = s_tot * inv_cnt
    var = jnp.maximum(ss_tot * inv_cnt - mean * mean, 0.0)
    scale = gamma * lax.rsqrt(var + eps)
    shift = beta - mean * scale

    # Pass 2: re-read each stored chunk, apply the folded normalize+affine and
    # LeakyReLU in a single scale/shift pass.
    def pass2(ci, _):
        m0 = pl.multiple_of(ci * tile_m, 128)
        r = o_ref[:, pl.ds(m0, tile_m)].astype(jnp.float32)
        o_ref[:, pl.ds(m0, tile_m)] = leaky(r * scale + shift).astype(o_ref.dtype)
        return 0

    lax.fori_loop(0, n_chunks, pass2, 0, unroll=n_chunks <= 4)


def _round_up(x, m):
    return (x + m - 1) // m * m


def _reflect_index(n_len, p):
    # nn.ReflectionPad2d index map (no edge repetition); requires p < n_len.
    idx = np.arange(-p, n_len + p)
    idx = np.abs(idx)
    idx = np.where(idx >= n_len, 2 * (n_len - 1) - idx, idx)
    return idx.astype(np.int32)


def _pick_cout_block(c_out, n_batch):
    blk = 128 if (c_out % 128 == 0) else c_out     # prefer 128 (v7x VMEM / MXU)
    # Expose a second "parallel" grid step when batch==1 (v7x second TC),
    # keeping the block a multiple of 8 for the (8,128) tiling rule.
    if n_batch == 1 and c_out == blk and blk % 16 == 0:
        blk //= 2
    return blk


def _vmem_limit_bytes():
    try:
        cap = getattr(pltpu.get_tpu_info(), "vmem_capacity_bytes", None)
        if cap:
            return int(min(cap * 3 // 4, 100 * 1024 * 1024))
    except Exception:
        pass
    return 64 * 1024 * 1024


def conv_layer_pallas(x, conv_w, conv_b, gamma=None, beta=None, *,
                      kernel_size=3, stride=1, relu=True, instance_norm=True,
                      eps=1e-5, compute_dtype=jnp.bfloat16):
    """x: (N, C_in, H, W) float32 NCHW.  conv_w: (C_out, C_in, 3, 3)."""
    n, c_in, h, w = x.shape
    c_out = conv_w.shape[0]
    assert conv_w.shape == (c_out, c_in, 3, 3)
    pad = kernel_size // 2
    dilation = pad                    # the module sets dilation = kernel_size // 2
    assert dilation >= 1, "kernel_size < 2 (dilation 0) is not representable"
    assert pad < h and pad < w        # ReflectionPad2d requirement
    assert stride == 1                # TODO(synk): strided subsampling not implemented

    h_pad, w_pad = h + 2 * pad, w + 2 * pad
    h_out, w_out = h_pad - 2 * dilation, w_pad - 2 * dilation   # == h, w
    m_total = h_out * w_pad           # GEMM N dim incl. per-row wrap columns

    # ---- spatial (M) chunking: bound in-kernel patch/acc VMEM --------------
    c_in_p = _round_up(c_in, 8)       # sublane-aligned tap slices
    itemsize = jnp.dtype(compute_dtype).itemsize
    target_tile = max(512, min(8192, (6 * 1024 * 1024) // (9 * c_in_p * itemsize)))
    n_chunks = -(-m_total // target_tile)
    tile_m = _round_up(-(-m_total // n_chunks), 128)
    m_pad = n_chunks * tile_m

    # ---- reflection pad + zero tail as ONE gather (single input HBM pass) --
    max_tap = (2 * w_pad + 2) * dilation
    l_in = _round_up(m_pad + max_tap, 128)
    rows = _reflect_index(h, pad)
    cols = _reflect_index(w, pad)
    flat_idx = (rows[:, None] * w + cols[None, :]).reshape(-1)   # (h_pad*w_pad,)
    gather_idx = np.zeros((l_in,), np.int32)   # tail values are never consumed
    gather_idx[:flat_idx.size] = flat_idx
    gather_idx = jnp.asarray(gather_idx)

    x_c = x.astype(compute_dtype)
    if c_in_p != c_in:
        x_c = jnp.pad(x_c, ((0, 0), (0, c_in_p - c_in), (0, 0), (0, 0)))
    x_flat = jnp.take(x_c.reshape(n, c_in_p, h * w), gather_idx, axis=2)

    # ---- fused weight (C_out, 9*C_in_p): column = (kh*3+kw)*C_in_p + c -----
    w_t = jnp.transpose(conv_w, (0, 2, 3, 1))            # (C_out, 3, 3, C_in)
    if c_in_p != c_in:
        w_t = jnp.pad(w_t, ((0, 0), (0, 0), (0, 0), (0, c_in_p - c_in)))
    w_fused = w_t.reshape(c_out, 9 * c_in_p).astype(compute_dtype)

    if gamma is None:
        gamma = jnp.ones((c_out,), jnp.float32)
    if beta is None:
        beta = jnp.zeros((c_out,), jnp.float32)
    params = jnp.stack([conv_b.astype(jnp.float32),
                        gamma.astype(jnp.float32),
                        beta.astype(jnp.float32)], axis=1)   # (C_out, 3)

    co_blk = _pick_cout_block(c_out, n)
    n_co = c_out // co_blk

    kernel = functools.partial(
        _conv_layer_kernel,
        dilation=dilation, w_pad=w_pad, w_out=w_out, h_out=h_out,
        tile_m=tile_m, n_chunks=n_chunks,
        instance_norm=instance_norm, relu=relu, eps=eps)

    out_flat = pl.pallas_call(
        kernel,
        out_shape=jax.ShapeDtypeStruct((n, c_out, m_pad), x.dtype),
        grid=(n, n_co),
        in_specs=[
            pl.BlockSpec((None, c_in_p, l_in), lambda i, j: (i, 0, 0)),
            pl.BlockSpec((co_blk, 9 * c_in_p), lambda i, j: (j, 0)),
            pl.BlockSpec((co_blk, 3), lambda i, j: (j, 0)),
        ],
        out_specs=pl.BlockSpec((None, co_blk, m_pad), lambda i, j: (i, j, 0)),
        compiler_params=pltpu.CompilerParams(
            dimension_semantics=("parallel", "parallel"),
            vmem_limit_bytes=_vmem_limit_bytes()),
    )(x_flat, w_fused, params)

    # Cheap wrapper-side crop of lane padding + per-row wrap columns.
    out = out_flat[:, :, :m_total].reshape(n, c_out, h_out, w_pad)[:, :, :, :w_out]
    return out


def conv_layer_ref(x, conv_w, conv_b, gamma, beta, *,
                   kernel_size=3, stride=1, relu=True, instance_norm=True,
                   eps=1e-5, compute_dtype=jnp.bfloat16):
    """Pure-JAX reference mirroring the PyTorch module (MXU operands rounded to
    compute_dtype exactly like the kernel, f32 accumulation)."""
    pad = kernel_size // 2
    dilation = pad
    xq = x.astype(compute_dtype).astype(jnp.float32)
    wq = conv_w.astype(compute_dtype).astype(jnp.float32)
    x_pad = jnp.pad(xq, ((0, 0), (0, 0), (pad, pad), (pad, pad)), mode="reflect")
    out = lax.conv_general_dilated(
        x_pad, wq,
        window_strides=(stride, stride),
        padding="VALID",
        rhs_dilation=(dilation, dilation),
        dimension_numbers=("NCHW", "OIHW", "NCHW"),
        preferred_element_type=jnp.float32)
    out = out + conv_b[None, :, None, None]
    if instance_norm:
        mean = jnp.mean(out, axis=(2, 3), keepdims=True)
        var = jnp.mean((out - mean) ** 2, axis=(2, 3), keepdims=True)
        out = (out - mean) * lax.rsqrt(var + eps)
        out = out * gamma[None, :, None, None] + beta[None, :, None, None]
    if relu:
        out = jnp.where(out >= 0.0, out, 0.2 * out)
    return out


if __name__ == "__main__":
    # ConvLayer(4, 8, kernel_size=3, stride=1, relu=True, instance_norm=True).
    N, C_IN, C_OUT, H, W = 2, 4, 8, 16, 16
    key = jax.random.PRNGKey(0)
    kx, kw, kb, kg, kbe = jax.random.split(key, 5)

    x = jax.random.normal(kx, (N, C_IN, H, W), jnp.float32)
    conv_w = 0.1 * jax.random.normal(kw, (C_OUT, C_IN, 3, 3), jnp.float32)
    conv_b = 0.1 * jax.random.normal(kb, (C_OUT,), jnp.float32)
    gamma = 1.0 + 0.1 * jax.random.normal(kg, (C_OUT,), jnp.float32)
    beta = 0.1 * jax.random.normal(kbe, (C_OUT,), jnp.float32)

    out = conv_layer_pallas(x, conv_w, conv_b, gamma, beta,
                            kernel_size=3, stride=1,
                            relu=True, instance_norm=True)
    out = jax.block_until_ready(out)

    ref = conv_layer_ref(x, conv_w, conv_b, gamma, beta,
                         kernel_size=3, stride=1,
                         relu=True, instance_norm=True)
    np.testing.assert_allclose(np.asarray(out), np.asarray(ref),
                               rtol=5e-4, atol=5e-4)
    print("KERNEL_OK")
</pallas_src>

<mosaic_0001>
module attributes {stable_mosaic.version = 11 : i64} {
  func.func @_conv_layer_kernel(%arg0: i32, %arg1: i32, %arg2: memref<1x8x512xbf16, #tpu.memory_space<vmem>>, %arg3: memref<8x72xbf16, #tpu.memory_space<vmem>>, %arg4: memref<8x3xf32, #tpu.memory_space<vmem>>, %arg5: memref<1x8x384xf32, #tpu.memory_space<vmem>>) attributes {dimension_semantics = [#tpu.dimension_semantics<parallel>, #tpu.dimension_semantics<parallel>], iteration_bounds = array<i64: 2, 1>, scalar_prefetch = 0 : i64, scratch_operands = 0 : i64, tpu.core_type = #tpu.core_type<tc>, window_params = [{transform_indices = @transform_0, window_bounds = array<i64: 1, 8, 512>}, {transform_indices = @transform_1, window_bounds = array<i64: 8, 72>}, {transform_indices = @transform_2, window_bounds = array<i64: 8, 3>}, {transform_indices = @transform_3, window_bounds = array<i64: 1, 8, 384>}]} {
    %c0 = arith.constant 0 : index
    %c0_0 = arith.constant 0 : index
    %0 = vector.load %arg3[%c0, %c0_0] : memref<8x72xbf16, #tpu.memory_space<vmem>>, vector<8x72xbf16>
    %c0_1 = arith.constant 0 : index
    %c1 = arith.constant 1 : index
    %1 = vector.load %arg4[%c0_1, %c1] : memref<8x3xf32, #tpu.memory_space<vmem>>, vector<8x1xf32>
    %c0_2 = arith.constant 0 : index
    %c2 = arith.constant 2 : index
    %2 = vector.load %arg4[%c0_2, %c2] : memref<8x3xf32, #tpu.memory_space<vmem>>, vector<8x1xf32>
    %c0_3 = arith.constant 0 : index
    %c0_4 = arith.constant 0 : index
    %c0_5 = arith.constant 0 : index
    %3 = vector.load %arg2[%c0_3, %c0_4, %c0_5] : memref<1x8x512xbf16, #tpu.memory_space<vmem>>, vector<1x8x384xbf16>
    %4 = vector.shape_cast %3 : vector<1x8x384xbf16> to vector<8x384xbf16>
    %c0_6 = arith.constant 0 : index
    %c0_7 = arith.constant 0 : index
    %c1_8 = arith.constant 1 : index
    %5 = vector.load %arg2[%c0_6, %c0_7, %c1_8] : memref<1x8x512xbf16, #tpu.memory_space<vmem>>, vector<1x8x384xbf16>
    %6 = vector.shape_cast %5 : vector<1x8x384xbf16> to vector<8x384xbf16>
    %c0_9 = arith.constant 0 : index
    %c0_10 = arith.constant 0 : index
    %c2_11 = arith.constant 2 : index
    %7 = vector.load %arg2[%c0_9, %c0_10, %c2_11] : memref<1x8x512xbf16, #tpu.memory_space<vmem>>, vector<1x8x384xbf16>
    %8 = vector.shape_cast %7 : vector<1x8x384xbf16> to vector<8x384xbf16>
    %c0_12 = arith.constant 0 : index
    %c0_13 = arith.constant 0 : index
    %c18 = arith.constant 18 : index
    %9 = vector.load %arg2[%c0_12, %c0_13, %c18] : memref<1x8x512xbf16, #tpu.memory_space<vmem>>, vector<1x8x384xbf16>
    %10 = vector.shape_cast %9 : vector<1x8x384xbf16> to vector<8x384xbf16>
    %c0_14 = arith.constant 0 : index
    %c0_15 = arith.constant 0 : index
    %c19 = arith.constant 19 : index
    %11 = vector.load %arg2[%c0_14, %c0_15, %c19] : memref<1x8x512xbf16, #tpu.memory_space<vmem>>, vector<1x8x384xbf16>
    %12 = vector.shape_cast %11 : vector<1x8x384xbf16> to vector<8x384xbf16>
    %c0_16 = arith.constant 0 : index
    %c0_17 = arith.constant 0 : index
    %c20 = arith.constant 20 : index
    %13 = vector.load %arg2[%c0_16, %c0_17, %c20] : memref<1x8x512xbf16, #tpu.memory_space<vmem>>, vector<1x8x384xbf16>
    %14 = vector.shape_cast %13 : vector<1x8x384xbf16> to vector<8x384xbf16>
    %c0_18 = arith.constant 0 : index
    %c0_19 = arith.constant 0 : index
    %c36 = arith.constant 36 : index
    %15 = vector.load %arg2[%c0_18, %c0_19, %c36] : memref<1x8x512xbf16, #tpu.memory_space<vmem>>, vector<1x8x384xbf16>
    %16 = vector.shape_cast %15 : vector<1x8x384xbf16> to vector<8x384xbf16>
    %c0_20 = arith.constant 0 : index
    %c0_21 = arith.constant 0 : index
    %c37 = arith.constant 37 : index
    %17 = vector.load %arg2[%c0_20, %c0_21, %c37] : memref<1x8x512xbf16, #tpu.memory_space<vmem>>, vector<1x8x384xbf16>
    %18 = vector.shape_cast %17 : vector<1x8x384xbf16> to vector<8x384xbf16>
    %c0_22 = arith.constant 0 : index
    %c0_23 = arith.constant 0 : index
    %c38 = arith.constant 38 : index
    %19 = vector.load %arg2[%c0_22, %c0_23, %c38] : memref<1x8x512xbf16, #tpu.memory_space<vmem>>, vector<1x8x384xbf16>
    %20 = vector.shape_cast %19 : vector<1x8x384xbf16> to vector<8x384xbf16>
    %21 = tpu.concatenate %4, %6, %8, %10, %12, %14, %16, %18, %20 in 0 : vector<8x384xbf16>, vector<8x384xbf16>, vector<8x384xbf16>, vector<8x384xbf16>, vector<8x384xbf16>, vector<8x384xbf16>, vector<8x384xbf16>, vector<8x384xbf16>, vector<8x384xbf16> -> vector<72x384xbf16>
    %cst = arith.constant dense<0.000000e+00> : vector<8x384xf32>
    %22 = tpu.matmul %0, %21, %cst {dimension_numbers = #tpu.dot_dimension_numbers<[1], [0], [0], [1], [0, 0, 1, 1], [], []>} : vector<8x72xbf16>, vector<72x384xbf16>, vector<8x384xf32> -> vector<8x384xf32>
    %23 = tpu.iota {dimensions = array<i32: 1>} : vector<1x384xi32>
    %c0_i32 = arith.constant 0 : i32
    %24 = vector.broadcast %c0_i32 : i32 to vector<1x384xi32>
    %25 = arith.addi %24, %23 : vector<1x384xi32>
    %c288_i32 = arith.constant 288 : i32
    %26 = vector.broadcast %c288_i32 : i32 to vector<1x384xi32>
    %27 = arith.cmpi slt, %25, %26 : vector<1x384xi32>
    %c18_i32 = arith.constant 18 : i32
    %c0_i32_24 = arith.constant 0 : i32
    %28 = arith.cmpi eq, %c18_i32, %c0_i32_24 : i32
    %c1_i32 = arith.constant 1 : i32
    %29 = arith.select %28, %c1_i32, %c18_i32 : i32
    %30 = vector.broadcast %29 : i32 to vector<1x384xi32>
    %31 = arith.remsi %25, %30 : vector<1x384xi32>
    %c0_i32_25 = arith.constant 0 : i32
    %32 = vector.broadcast %c0_i32_25 : i32 to vector<1x384xi32>
    %33 = arith.cmpi ne, %31, %32 : vector<1x384xi32>
    %c0_i32_26 = arith.constant 0 : i32
    %34 = vector.broadcast %c0_i32_26 : i32 to vector<1x384xi32>
    %35 = arith.cmpi slt, %31, %34 : vector<1x384xi32>
    %c0_i32_27 = arith.constant 0 : i32
    %36 = arith.cmpi slt, %29, %c0_i32_27 : i32
    %37 = vector.broadcast %36 : i1 to vector<1x384xi1>
    %38 = vector.broadcast %37 : vector<1x384xi1> to vector<1x384xi1>
    %39 = arith.xori %35, %38 : vector<1x384xi1>
    %40 = arith.andi %39, %33 : vector<1x384xi1>
    %41 = vector.broadcast %29 : i32 to vector<1x384xi32>
    %42 = arith.addi %31, %41 : vector<1x384xi32>
    %43 = arith.select %40, %42, %31 : vector<1x384xi1>, vector<1x384xi32>
    %c16_i32 = arith.constant 16 : i32
    %44 = vector.broadcast %c16_i32 : i32 to vector<1x384xi32>
    %45 = arith.cmpi slt, %43, %44 : vector<1x384xi32>
    %46 = arith.andi %27, %45 : vector<1x384xi1>
    %cst_28 = arith.constant 0.000000e+00 : f32
    %47 = vector.shape_cast %46 : vector<1x384xi1> to vector<1x384xi1>
    %48 = vector.broadcast %47 : vector<1x384xi1> to vector<8x384xi1>
    %49 = vector.broadcast %cst_28 : f32 to vector<8x384xf32>
    %50 = arith.select %48, %22, %49 : vector<8x384xi1>, vector<8x384xf32>
    %cst_29 = arith.constant dense<0.000000e+00> : vector<8xf32>
    %51 = vector.multi_reduction <add>, %50, %cst_29 [1] : vector<8x384xf32> to vector<8xf32>
    %52 = vector.shape_cast %51 : vector<8xf32> to vector<8x1xf32>
    %cst_30 = arith.constant 3.906250e-03 : f32
    %53 = vector.broadcast %cst_30 : f32 to vector<8x1xf32>
    %54 = arith.mulf %52, %53 : vector<8x1xf32>
    %55 = arith.mulf %50, %50 : vector<8x384xf32>
    %cst_31 = arith.constant dense<0.000000e+00> : vector<8xf32>
    %56 = vector.multi_reduction <add>, %55, %cst_31 [1] : vector<8x384xf32> to vector<8xf32>
    %57 = vector.shape_cast %56 : vector<8xf32> to vector<8x1xf32>
    %cst_32 = arith.constant 3.906250e-03 : f32
    %58 = vector.broadcast %cst_32 : f32 to vector<8x1xf32>
    %59 = arith.mulf %57, %58 : vector<8x1xf32>
    %60 = arith.mulf %54, %54 : vector<8x1xf32>
    %61 = arith.subf %59, %60 : vector<8x1xf32>
    %cst_33 = arith.constant 0.000000e+00 : f32
    %62 = vector.broadcast %cst_33 : f32 to vector<8x1xf32>
    %63 = arith.maximumf %61, %62 : vector<8x1xf32>
    %cst_34 = arith.constant 9.99999974E-6 : f32
    %64 = vector.broadcast %cst_34 : f32 to vector<8x1xf32>
    %65 = arith.addf %63, %64 : vector<8x1xf32>
    %66 = math.rsqrt %65 : vector<8x1xf32>
    %67 = arith.mulf %1, %66 : vector<8x1xf32>
    %68 = arith.mulf %54, %67 : vector<8x1xf32>
    %69 = arith.subf %2, %68 : vector<8x1xf32>
    %70 = vector.broadcast %67 : vector<8x1xf32> to vector<8x384xf32>
    %71 = arith.mulf %22, %70 : vector<8x384xf32>
    %72 = vector.broadcast %69 : vector<8x1xf32> to vector<8x384xf32>
    %73 = arith.addf %71, %72 : vector<8x384xf32>
    %cst_35 = arith.constant 2.000000e-01 : f32
    %74 = vector.broadcast %cst_35 : f32 to vector<8x384xf32>
    %75 = arith.mulf %74, %73 : vector<8x384xf32>
    %76 = arith.maximumf %73, %75 : vector<8x384xf32>
    %c0_36 = arith.constant 0 : index
    %c0_37 = arith.constant 0 : index
    %c0_38 = arith.constant 0 : index
    %77 = vector.load %arg5[%c0_36, %c0_37, %c0_38] : memref<1x8x384xf32, #tpu.memory_space<vmem>>, vector<1x8x384xf32>
    %78 = vector.shape_cast %77 : vector<1x8x384xf32> to vector<8x384xf32>
    %79 = vector.shape_cast %76 : vector<8x384xf32> to vector<1x8x384xf32>
    tpu.vector_store %arg5[%c0_36, %c0_37, %c0_38], %79 {strides = array<i32>} : memref<1x8x384xf32, #tpu.memory_space<vmem>>, vector<1x8x384xf32>,
    return
  }
  func.func @transform_0(%arg0: i32, %arg1: i32) -> (i32, i32, i32) {
    %c0_i32 = arith.constant 0 : i32
    %c0_i32_0 = arith.constant 0 : i32
    %c0_i32_1 = arith.constant 0 : i32
    return %arg0, %c0_i32, %c0_i32_0 : i32, i32, i32
  }
  func.func @transform_1(%arg0: i32, %arg1: i32) -> (i32, i32) {
    %c0_i32 = arith.constant 0 : i32
    %c0_i32_0 = arith.constant 0 : i32
    return %arg1, %c0_i32 : i32, i32
  }
  func.func @transform_2(%arg0: i32, %arg1: i32) -> (i32, i32) {
    %c0_i32 = arith.constant 0 : i32
    %c0_i32_0 = arith.constant 0 : i32
    return %arg1, %c0_i32 : i32, i32
  }
  func.func @transform_3(%arg0: i32, %arg1: i32) -> (i32, i32, i32) {
    %c0_i32 = arith.constant 0 : i32
    %c0_i32_0 = arith.constant 0 : i32
    return %arg0, %arg1, %c0_i32 : i32, i32, i32
  }
}

</mosaic_0001>

<bundles_post_ra>
// kernel: tpu_custom_call.1
= control target key start
LH: loop header
LB: loop body
LE: loop exit
PB: predicated region body
PF: predicated region fallthrough
CT: control target
= control target key end

     0   :  { %8 = vsyncpa [#allocation3], 0  ;;  %s1418_s0 = inlined_call_operand.hbm [shape: bf16[2,8,512], index: 0, kind: input, shape index: {}]   ;;  %s1419_s1 = inlined_call_operand.hbm [shape: bf16[8,72], index: 1, kind: input, shape index: {}]   ;;  %s1420_s2 = inlined_call_operand.hbm [shape: f32[8,3], index: 2, kind: input, shape index: {}]   ;;  %s1421_s3 = inlined_call_operand.hbm [shape: f32[2,8,384], index: 3, kind: output, shape index: {}]  }
   0x1   :  { %10 = vsyncpa [#allocation3 + $0x1], 0 }
   0x2   :  { %11 = vsyncpa [#allocation6], 0 }
   0x3   :  { %12 = vsyncpa [#allocation4], 0 }
   0x4   :  { %14 = vsyncpa [#allocation4 + $0x1], 0  ;;  %s1118_s12 = smov 0   ;;  %s1120_s13 = smov 0  }
   0x5   :  { %s1122_s14 = smov 0   ;;  %s1124_s15 = smov 0  }
   0x6   :  { %s1126_s16 = smov 0   ;;  %s1128_s17 = smov 0  }
   0x7 LB: > { %s745_s18 = sadd.s32 4294967295, %s1078_s17   ;;  %s746_s19 = sadd.s32 4294967294, %s1078_s17   ;;  %s1078_s17 = sphi %s1128_s17, %s20_s17   ;;  %s1074_s16 = sphi %s1126_s16, %s1444_s16   ;;  %s1070_s15 = sphi %s1124_s15, %s1443_s15   ;;  %s1066_s14 = sphi %s1122_s14, %s1442_s14   ;;  %s1062_s13 = sphi %s1120_s13, %s1441_s13   ;;  %s1058_s12 = sphi %s1118_s12, %s1440_s12  }
   0x8   : > { %p52_p0 = scmp.ne.s32.totalorder %s1062_s13, %s1058_s12  ;;  %p1152_p1 = scmp.eq.s32.totalorder %s745_s18, 0 }
   0x9   : > { %p1156_p2 = scmp.eq.s32.totalorder %s745_s18, 1  ;;  %p136_p3 = scmp.eq.s32.totalorder %s746_s19, 1 }
   0xa   : > { %s1426_s20 = scalar_select %p1152_p1, 1, 0 }
   0xb   : > { %s1427_s21 = scalar_select %p1156_p2, 1, 0 }
   0xc   : > { %p1162_p4 = por %p1152_p1, %p52_p0  ;;  %p747_p5 = scmp.ge.s32.totalorder %s1078_s17, 1 }
   0xd   : > { %p1167_p6 = por %p136_p3, %p52_p0  ;;  %p143_p7 = scmp.lt.s32.totalorder %s1078_s17, 3 }
   0xe   : > { %s1428_s22 = scalar_select %p1162_p4, 1, 0 }
   0xf   : > { %s1429_s23 = scalar_select %p1167_p6, 1, 0 }
  0x10   : > { %p1172_p8 = pnand %p747_p5, %p143_p7  ;;  %s1080_s25 = smov [#allocation5]  }
  0x11   : > { %s158_s26 = sshll.u32 %s1080_s25, 4  ;;  %s1081_s27 = smov [#allocation7]   ;;  %s159_s26 = int_to_ptr.vmem [resolvable:$true] %s158_s26 }
  0x12   : > { %s1430_s24 = scalar_select %p1172_p8, 1, 0 }
  0x13   : > { %p812_p10 = pneg %p1172_p8  ;;  %s171_s28 = sshll.u32 %s1081_s27, 4  ;;  %s1185_s28 = int_to_ptr.vmem [resolvable:$true] %s171_s28 }
  0x14   : > { %s906_s5 = scalar_lea.hbm %s1419_s1, 64 }
  0x15   : > { %p1181_p11 = pnand %p812_p10, %p1152_p1  ;;  %p907_p12 = scmp.ne.s32.totalorder %s1419_s1, %s906_s5 }
  0x16   : > { %p913_p5 = scmp.lt.u32.totalorder %s906_s5, %s1419_s1 }
  0x17   : > { %p908_p13 = pneg %p1181_p11 }
  0x19   : > { %p909_p0 = pnand %p908_p13, %p907_p12 }
  0x1b   : > { %p910_p3 = pneg %p909_p0 }
  0x1d   : > { %p915_p7 = pnand %p913_p5, %p910_p3 }
  0x1f   : > { %918 = shalt.err (!%p915_p7)
}
  0x20   : > { %s919_s10 = scalar_lea.vmem %s159_s26, 64  ;;  %p927_p1 = scmp.lt.s32.totalorder %s159_s26, %s159_s26 }
  0x21   : > { %p920_p10 = scmp.ne.s32.totalorder %s159_s26, %s919_s10  ;;  %p928_p4 = scmp.lt.s32.totalorder %s919_s10, %s919_s10 }
  0x23   : > { %p922_p9 = pnand %p920_p10, %p908_p13  ;;  %p929_p8 = por %p928_p4, %p927_p1 }
  0x25   : > { %p923_p6 = pneg %p922_p9 }
  0x27   : > { %p930_p2 = pnand %p929_p8, %p923_p6 }
  0x29   : > { %933 = shalt.err (!%p930_p2)
}
  0x2a   : > { %815 = dma.hbm_to_vmem [thread:$0]  (!%p1181_p11), %s1419_s1, 64, %s159_s26, [#allocation6]  }
  0x2b   : > { %s934_s27 = scalar_lea.hbm %s1420_s2, 128 }
  0x2c   : > { %p935_p9 = scmp.ne.s32.totalorder %s1420_s2, %s934_s27  ;;  %p941_p2 = scmp.lt.u32.totalorder %s934_s27, %s1420_s2 }
  0x2e   : > { %p937_p1 = pnand %p935_p9, %p908_p13 }
  0x30   : > { %p938_p4 = pneg %p937_p1 }
  0x32   : > { %p943_p6 = pnand %p941_p2, %p938_p4 }
  0x34   : > { %946 = shalt.err (!%p943_p6)
}
  0x35   : > { %s947_s26 = scalar_lea.vmem %s1185_s28, 128  ;;  %p955_p3 = scmp.lt.s32.totalorder %s1185_s28, %s1185_s28 }
  0x36   : > { %p948_p8 = scmp.ne.s32.totalorder %s1185_s28, %s947_s26  ;;  %p956_p5 = scmp.lt.s32.totalorder %s947_s26, %s947_s26 }
  0x38   : > { %p950_p12 = pnand %p948_p8, %p908_p13  ;;  %p957_p7 = por %p956_p5, %p955_p3 }
  0x3a   : > { %p951_p0 = pneg %p950_p12 }
  0x3c   : > { %p958_p10 = pnand %p957_p7, %p951_p0 }
  0x3e   : > { %961 = shalt.err (!%p958_p10)
}
  0x3f   : > { %818 = dma.hbm_to_vmem [thread:$0]  (!%p1181_p11), %s1420_s2, 128, %s1185_s28, [#allocation6]  }
  0x40   : > { %s32_s9 = sadd.s32 1, %s1074_s16  ;;  %s39_s10 = sadd.s32 1, %s1066_s14 }
  0x41   : > { %p34_p13 = scmp.ge.s32.totalorder %s32_s9, 2  ;;  %p46_p9 = scmp.ne.s32.totalorder %s1066_s14, %s1062_s13 }
  0x42   : > { %p47_p1 = scmp.eq.s32.totalorder %s1078_s17, 0  ;;  %p829_p4 = scmp.lt.s32.totalorder %s1078_s17, 2 }
  0x43   : > { %s1446_s9 = smov (%p34_p13, %s32_s9), 0  ;;  %p1432_p6 = scmp.ne.s32.totalorder %s1427_s21, 0 }
  0x44   : > { %p48_p2 = por %p47_p1, %p46_p9  ;;  %s36_s11 = ssub.s32 %s1074_s16, %s1446_s9 }
  0x45   : > { %p1244_p8 = por %p1432_p6, %p46_p9  ;;  %s182_s18 = sand.u32 1, %s1066_s14  }
  0x46   : > { %p37_p12 = scmp.eq.s32.totalorder %s36_s11, 0  ;;  %s751_s28 = sshll.u32 %s182_s18, 4 }
  0x47   : > { %s771_s19 = sshll.u32 %s1074_s16, 8  ;;  %s186_s21 = scalar_lea.vmem [#allocation2], %s751_s28 }
  0x48   : > { %s1253_s25 = scalar_select %p37_p12, %s1066_s14, %s39_s10  }
  0x49   : > { %s1258_s4 = scalar_lea.hbm %s1418_s0, %s771_s19  ;;  %s194_s5 = sshll.u32 %s186_s21, 4  ;;  %s1266_s5 = int_to_ptr.vmem [resolvable:$true] %s194_s5 }
  0x4a   : > { %p1262_p11 = pnand %p829_p4, %p48_p2  ;;  %s183_s26 = scalar_lea.sflag [#allocation3], %s182_s18 }
  0x4b   : > { %s962_s7 = scalar_lea.hbm %s1258_s4, 256  ;;  %s967_s11 = scalar_lea.hbm %s1418_s0, 512 }
  0x4c   : > { %p963_p0 = scmp.ne.s32.totalorder %s1258_s4, %s962_s7  ;;  %p964_p3 = pneg %p1262_p11 }
  0x4d   : > { %p968_p10 = scmp.lt.u32.totalorder %s1258_s4, %s1418_s0  ;;  %p969_p13 = scmp.lt.u32.totalorder %s967_s11, %s962_s7 }
  0x4e   : > { %p965_p5 = pnand %p964_p3, %p963_p0  ;;  %p971_p1 = scmp.lt.u32.totalorder %s962_s7, %s1258_s4 }
  0x4f   : > { %p970_p9 = por %p969_p13, %p968_p10 }
  0x50   : > { %p966_p7 = pneg %p965_p5 }
  0x51   : > { %p972_p4 = por %p971_p1, %p970_p9 }
  0x53   : > { %p973_p2 = pnand %p972_p4, %p966_p7 }
  0x55   : > { %976 = shalt.err (!%p973_p2)
}
  0x56   : > { %s977_s18 = scalar_lea.vmem %s1266_s5, 256  ;;  %s1082_s27 = smov [#allocation2]  }
  0x57   : > { %p978_p6 = scmp.ne.s32.totalorder %s1266_s5, %s977_s18  ;;  %s982_s30 = sshll.u32 %s1082_s27, 4  ;;  %s983_s30 = int_to_ptr.vmem [resolvable:$false] %s982_s30 }
  0x58   : > { %s984_s21 = scalar_lea.vmem %s983_s30, 512  ;;  %p985_p5 = scmp.lt.s32.totalorder %s1266_s5, %s983_s30 }
  0x59   : > { %p980_p12 = pnand %p978_p6, %p964_p3  ;;  %p986_p10 = scmp.lt.s32.totalorder %s984_s21, %s977_s18 }
  0x5b   : > { %p981_p0 = pneg %p980_p12  ;;  %p987_p13 = por %p986_p10, %p985_p5 }
  0x5d   : > { %p988_p9 = pnand %p987_p13, %p981_p0 }
  0x5f   : > { %991 = shalt.err (!%p988_p9)
}
  0x60   : > { %822 = dma.hbm_to_vmem [thread:$0]  (!%p1262_p11), %s1258_s4, 256, %s1266_s5, %s183_s26  }
  0x61   : > { %p1435_p7 = scmp.ne.s32.totalorder %s1430_s24, 0 }
  0x62   : > { %s1296_s7 = sand.u32 (!%p1435_p7), 1, %s1062_s13   ;;  %p1436_p3 = scmp.ne.s32.totalorder (!%p1435_p7), %s1428_s22, 0 }
  0x63   : > { %203 = sbr.rel (%p1435_p7) target bundleno = 944 (0x3b0), region = 32  ;;  %s755_s8 = sshll.u32 (!%p1435_p7), %s1296_s7, 4 }
  0x64   : > { %s206_s10 = scalar_lea.sflag (!%p1435_p7), [#allocation3], %s1296_s7  ;;  %s1300_s11 = scalar_lea.vmem (!%p1435_p7), [#allocation2], %s755_s8 }
  0x6a   : > { %1045 = dma.done.wait (%p1436_p3), %s206_s10, 256  }
  0x6b   : > { %1047 = vsyncadd (%p1436_p3), %s206_s10, 4294967040  ;;  %p1437_p11 = scmp.ne.s32.totalorder %s1426_s20, 0 }
  0x6d   : > { %1049 = dma.done.wait (%p1437_p11), [#allocation6], 192  }
  0x6e   : > { %1051 = vsyncadd (%p1437_p11), [#allocation6], 4294967104  ;;  %v1083_v0 = vmov 0.0   ;;  %v245_v1 = vld [vmem:[%s1300_s11] sm:$0xff]  ;;  %v246_v2 = vld [vmem:[%s1300_s11 + $0x8] sm:$0xff]  ;;  %s1084_s24 = smov 127  }
  0x6f   : > { %778 = vmatprep.subr.bf16.mxu1 %v1083_v0  ;;  %v762_v3 = vcombine.high %v245_v1, %v245_v1  ;;  %v761_v4 = vcombine.low %v245_v1, %v245_v1  ;;  %v763_v5 = vcombine.low %v246_v2, %v246_v2  ;;  %v764_v6 = vcombine.high %v246_v2, %v246_v2  ;;  %s1085_s22 = smov 126   ;;  %s1086_s20 = smov 110   ;;  %v903_v10 = vld [vmem:[%s1300_s11 + $0x8] ss:$0 sps:$4 sm:$0xff]  }
  0x70   : > { %s1087_s4 = smov 109   ;;  %s1088_s5 = smov 108   ;;  %v1091_v7 = vmov 0   ;;  %vm1092_vm0 = vmmov 0   ;;  %vm273_vm1 = vcmask 1039360   ;;  %vm361_vm2 = vcmask 1043456  }
  0x71   : > { %267 = vrot.lane.b32.xlu0 %v762_v3, %s1084_s24  ;;  %265 = vrot.lane.b32.xlu1 %v761_v4, %s1084_s24  ;;  %s1089_s6 = smov 92   ;;  %s1090_s26 = smov 91   ;;  %vm285_vm3 = vcmask 1031168   ;;  %vm297_vm4 = vcmask 900096   ;;  %vm309_vm5 = vcmask 891904   ;;  %vm321_vm6 = vcmask 883712  }
  0x72   : > { %455 = vmatprep.mubr.bf16.mxu0 %v1091_v7  ;;  %788 = vmatprep.mubr.msk.bf16.mxu1 %vm1092_vm0, %v1083_v0  ;;  %s1093_s28 = smov 90   ;;  %vm333_vm7 = vcmask 752640   ;;  %vm345_vm8 = vcmask 744448   ;;  %vm357_vm9 = vcmask 736256   ;;  %vm410_vm10 = vcmask 588800   ;;  %s1096_s19 = smov 1  }
  0x73   : > { %s792_s18 = smul.u32 24, %s1296_s7 }
  0x74   : > { %s799_s27 = smul.u32 384, %s1070_s15  ;;  %s625_s15 = scalar_lea.sflag [#allocation4], %s1296_s7 }
  0x75   : > { %269 = vrot.lane.b32.xlu0 %v763_v5, %s1084_s24  ;;  %271 = vrot.lane.b32.xlu1 %v764_v6, %s1084_s24  ;;  %s239_s30 = scalar_lea.vmem [#allocation8], %s792_s18 }
  0x76   : > { %s641_s21 = sshll.u32 %s239_s30, 4  ;;  %s1369_s11 = scalar_lea.hbm %s1421_s3, %s799_s27  ;;  %s1371_s21 = int_to_ptr.vmem [resolvable:$true] %s641_s21 }
  0x77   : > { %s992_s24 = scalar_lea.vmem %s1371_s21, 384 }
  0x78   : > { %p993_p1 = scmp.ne.s32.totalorder %s1371_s21, %s992_s24 }
  0x79   : > { %279 = vrot.lane.b32.xlu0 %v762_v3, %s1085_s22  ;;  %281 = vrot.lane.b32.xlu1 %v763_v5, %s1085_s22 }
  0x7a   : > { %p994_p4 = pnand %p993_p1, %p1244_p8 }
  0x7c   : > { %p995_p2 = pneg %p994_p4 }
  0x7d   : > { %291 = vrot.lane.b32.xlu0 %v762_v3, %s1086_s20  ;;  %293 = vrot.lane.b32.xlu1 %v763_v5, %s1086_s20 }
  0x81   : > { %277 = vrot.lane.b32.xlu0 %v761_v4, %s1085_s22  ;;  %289 = vrot.lane.b32.xlu1 %v761_v4, %s1086_s20 }
  0x85   : > { %283 = vrot.lane.b32.xlu0 %v764_v6, %s1085_s22  ;;  %295 = vrot.lane.b32.xlu1 %v764_v6, %s1086_s20  ;;  %s1097_s22 = smov [#allocation8]  }
  0x86   : > { %s996_s20 = sshll.u32 %s1097_s22, 4  ;;  %s997_s20 = int_to_ptr.vmem [resolvable:$false] %s996_s20 }
  0x87   : > { %p999_p6 = scmp.lt.s32.totalorder %s1371_s21, %s997_s20 }
  0x89   : > { %303 = vrot.lane.b32.xlu0 %v762_v3, %s1087_s4  ;;  %305 = vrot.lane.b32.xlu1 %v763_v5, %s1087_s4 }
  0x8d   : > { %315 = vrot.lane.b32.xlu0 %v762_v3, %s1088_s5  ;;  %317 = vrot.lane.b32.xlu1 %v763_v5, %s1088_s5 }
  0x91   : > { %301 = vrot.lane.b32.xlu0 %v761_v4, %s1087_s4  ;;  %313 = vrot.lane.b32.xlu1 %v761_v4, %s1088_s5 }
  0x95   : > { %307 = vrot.lane.b32.xlu0 %v764_v6, %s1087_s4  ;;  %319 = vrot.lane.b32.xlu1 %v764_v6, %s1088_s5  ;;  %s998_s4 = scalar_lea.vmem %s997_s20, 768 }
  0x96   : > { %p1000_p12 = scmp.lt.s32.totalorder %s998_s4, %s992_s24 }
  0x98   : > { %p1001_p0 = por %p1000_p12, %p999_p6 }
  0x99   : > { %327 = vrot.lane.b32.xlu0 %v762_v3, %s1089_s6  ;;  %329 = vrot.lane.b32.xlu1 %v763_v5, %s1089_s6 }
  0x9a   : > { %p1002_p5 = pnand %p1001_p0, %p995_p2 }
  0x9d   : > { %339 = vrot.lane.b32.xlu0 %v762_v3, %s1090_s26  ;;  %341 = vrot.lane.b32.xlu1 %v763_v5, %s1090_s26 }
  0xa1   : > { %325 = vrot.lane.b32.xlu0 %v761_v4, %s1089_s6  ;;  %337 = vrot.lane.b32.xlu1 %v761_v4, %s1090_s26 }
  0xa5   : > { %331 = vrot.lane.b32.xlu0 %v764_v6, %s1089_s6  ;;  %343 = vrot.lane.b32.xlu1 %v764_v6, %s1090_s26 }
  0xa9   : > { %349 = vrot.lane.b32.xlu0 %v761_v4, %s1093_s28  ;;  %351 = vrot.lane.b32.xlu1 %v762_v3, %s1093_s28 }
  0xad   : > { %353 = vrot.lane.b32.xlu0 %v763_v5, %s1093_s28  ;;  %355 = vrot.lane.b32.xlu1 %v764_v6, %s1093_s28 }
  0xe3   : > { %v268_v8 = vpop.permute.xlu0 %267  ;;  %v266_v9 = vpop.permute.xlu1 %265 }
  0xe4   : > { %v274_v11 = vsel %vm273_vm1, %v266_v9, %v268_v8 }
  0xe5   : > { %v364_v18 = vsel %vm361_vm2, %v761_v4, %v274_v11 }
  0xe7   : > { %v270_v12 = vpop.permute.xlu0 %269  ;;  %v272_v13 = vpop.permute.xlu1 %271 }
  0xe8   : > { %v275_v14 = vsel %vm273_vm1, %v268_v8, %v270_v12  ;;  %v276_v15 = vsel %vm273_vm1, %v270_v12, %v272_v13 }
  0xe9   : > { %v368_v16 = vsel %vm361_vm2, %v762_v3, %v275_v14  ;;  %v372_v17 = vsel %vm361_vm2, %v903_v10, %v276_v15 }
  0xea   : > { %423 = vmatprep.subr.bf16.mxu0 %v368_v16  ;;  %779 = vmatpush3.bf16.msra.mxu1 %v372_v17  ;;  %v241_v16 = vld [vmem:[#allocation5] sm:$0xf]  ;;  %v504_v17 = vlaneseq }
  0xeb   : > { %v280_v19 = vpop.permute.xlu0 %279  ;;  %v282_v20 = vpop.permute.xlu1 %281  ;;  %424 = vmatpush1.bf16.msra.mxu0 %v364_v18  ;;  %780 = vmatprep.subr.bf16.mxu1 %v1083_v0 }
  0xec   : > { %v287_v23 = vsel %vm285_vm3, %v280_v19, %v282_v20  ;;  %v505_v18 = vand.u32 127, %v504_v17 }
  0xef   : > { %v292_v21 = vpop.permute.xlu0 %291  ;;  %v294_v22 = vpop.permute.xlu1 %293 }
  0xf0   : > { %v299_v24 = vsel %vm297_vm4, %v292_v21, %v294_v22 }
  0xf1   : > { %v380_v25 = vsel %vm361_vm2, %v287_v23, %v299_v24 }
  0xf2   : > { %425 = vmatprep.subr.bf16.mxu0 %v380_v25 }
  0xf3   : > { %v278_v26 = vpop.permute.xlu0 %277  ;;  %v290_v27 = vpop.permute.xlu1 %289 }
  0xf4   : > { %v286_v28 = vsel %vm285_vm3, %v278_v26, %v280_v19  ;;  %v298_v29 = vsel %vm297_vm4, %v290_v27, %v292_v21  ;;  %v506_v21 = vadd.s32 128, %v505_v18 }
  0xf5   : > { %v376_v30 = vsel %vm361_vm2, %v286_v28, %v298_v29 }
  0xf6   : > { %426 = vmatpush1.bf16.msra.mxu0 %v376_v30  ;;  %v1358_v24 = vmul.u32.u64.low 3817748708, %v506_v21  ;;  %v1359_v25 = vmul.u32.u64.high 3817748708, %v506_v21, %v1358_v24 }
  0xf7   : > { %v284_v31 = vpop.permute.xlu0 %283  ;;  %v296_v32 = vpop.permute.xlu1 %295 }
  0xf8   : > { %v288_v33 = vsel %vm285_vm3, %v282_v20, %v284_v31  ;;  %v300_v34 = vsel %vm297_vm4, %v294_v22, %v296_v32  ;;  %v1355_v22 = vmul.u32.u64.low 3817748708, %v505_v18  ;;  %v1356_v23 = vmul.u32.u64.high 3817748708, %v505_v18, %v1355_v22 }
  0xf9   : > { %v384_v35 = vsel %vm361_vm2, %v288_v33, %v300_v34  ;;  %v528_v29 = vshrl.u32 %v1359_v25, 4 }
  0xfa   : > { %781 = vmatpush3.bf16.msra.mxu1 %v384_v35  ;;  %v517_v27 = vshrl.u32 %v1356_v23, 4 }
  0xfb   : > { %v304_v36 = vpop.permute.xlu0 %303  ;;  %v306_v37 = vpop.permute.xlu1 %305  ;;  %782 = vmatprep.subr.bf16.mxu1 %v1083_v0  ;;  %v529_v32 = vmul.u32 18, %v528_v29 }
  0xfc   : > { %v311_v40 = vsel %vm309_vm5, %v304_v36, %v306_v37  ;;  %v518_v30 = vmul.u32 18, %v517_v27 }
  0xfd   : > { %v530_v34 = vsub.s32 %v506_v21, %v529_v32 }
  0xfe   : > { %v519_v33 = vsub.s32 %v505_v18, %v518_v30 }
  0xff   : > { %v316_v38 = vpop.permute.xlu0 %315  ;;  %v318_v39 = vpop.permute.xlu1 %317  ;;  %vm545_vm0 = vcmp.ne.s32.totalorder %v530_v34, 0  ;;  %vm548_vm1 = vcmp.lt.s32.totalorder %v530_v34, 0 }
 0x100   : > { %v323_v41 = vsel %vm321_vm6, %v316_v38, %v318_v39  ;;  %vm544_vm13 = vcmp.ne.s32.totalorder %v519_v33, 0  ;;  %vm547_vm14 = vcmp.lt.s32.totalorder %v519_v33, 0  ;;  %vm551_vm3 = vmand %vm548_vm1, %vm545_vm0 }
 0x101   : > { %v392_v42 = vsel %vm361_vm2, %v311_v40, %v323_v41 }
 0x102   : > { %427 = vmatprep.subr.bf16.mxu0 %v392_v42 }
 0x103   : > { %v302_v43 = vpop.permute.xlu0 %301  ;;  %v314_v44 = vpop.permute.xlu1 %313 }
 0x104   : > { %v310_v45 = vsel %vm309_vm5, %v302_v43, %v304_v36  ;;  %v322_v46 = vsel %vm321_vm6, %v314_v44, %v316_v38  ;;  %v553_v36 = vadd.s32 18, %v519_v33  ;;  %v554_v38 = vadd.s32 18, %v530_v34 }
 0x105   : > { %v388_v47 = vsel %vm361_vm2, %v310_v45, %v322_v46 }
 0x106   : > { %428 = vmatpush1.bf16.msra.mxu0 %v388_v47  ;;  %v557_v40 = vsel %vm551_vm3, %v554_v38, %v530_v34 }
 0x107   : > { %v308_v48 = vpop.permute.xlu0 %307  ;;  %v320_v49 = vpop.permute.xlu1 %319 }
 0x108   : > { %v312_v50 = vsel %vm309_vm5, %v306_v37, %v308_v48  ;;  %v324_v51 = vsel %vm321_vm6, %v318_v39, %v320_v49 }
 0x109   : > { %v396_v52 = vsel %vm361_vm2, %v312_v50, %v324_v51 }
 0x10a   : > { %783 = vmatpush3.bf16.msra.mxu1 %v396_v52 }
 0x10b   : > { %v328_v53 = vpop.permute.xlu0 %327  ;;  %v330_v54 = vpop.permute.xlu1 %329  ;;  %784 = vmatprep.subr.bf16.mxu1 %v1083_v0 }
 0x10c   : > { %v335_v57 = vsel %vm333_vm7, %v328_v53, %v330_v54 }
 0x10f   : > { %v340_v55 = vpop.permute.xlu0 %339  ;;  %v342_v56 = vpop.permute.xlu1 %341 }
 0x110   : > { %v347_v58 = vsel %vm345_vm8, %v340_v55, %v342_v56 }
 0x111   : > { %v404_v59 = vsel %vm361_vm2, %v335_v57, %v347_v58 }
 0x112   : > { %429 = vmatprep.subr.bf16.mxu0 %v404_v59  ;;  %v1094_v59 = vmov 1  }
 0x113   : > { %v326_v60 = vpop.permute.xlu0 %325  ;;  %v338_v61 = vpop.permute.xlu1 %337  ;;  %897 = vset.pattern.permute.xlu1 %v1094_v59 }
 0x114   : > { %v334_v62 = vsel %vm333_vm7, %v326_v60, %v328_v53  ;;  %v346_v63 = vsel %vm345_vm8, %v338_v61, %v340_v55 }
 0x115   : > { %v400_v1 = vsel %vm361_vm2, %v334_v62, %v346_v63 }
 0x116   : > { %430 = vmatpush1.bf16.msra.mxu0 %v400_v1 }
 0x117   : > { %v332_v2 = vpop.permute.xlu0 %331  ;;  %v344_v3 = vpop.permute.xlu1 %343 }
 0x118   : > { %v336_v4 = vsel %vm333_vm7, %v330_v54, %v332_v2  ;;  %v348_v5 = vsel %vm345_vm8, %v342_v56, %v344_v3  ;;  %vm560_vm8 = vcmp.lt.s32.totalorder %v557_v40, 16 }
 0x119   : > { %v408_v6 = vsel %vm361_vm2, %v336_v4, %v348_v5  ;;  %v1095_v5 = vmov 2  }
 0x11a   : > { %785 = vmatpush3.bf16.msra.mxu1 %v408_v6  ;;  %898 = vset.pattern.permute.xlu0 %v1095_v5  ;;  %v242_v6 = vld [vmem:[#allocation7] sm:$0xff] }
 0x11b   : > { %v350_v7 = vpop.permute.xlu0 %349  ;;  %v352_v8 = vpop.permute.xlu1 %351  ;;  %786 = vmatprep.subr.bf16.mxu1 %v1083_v0  ;;  %v507_v0 = vadd.s32 256, %v505_v18 }
 0x11c   : > { %v358_v9 = vsel %vm357_vm9, %v350_v7, %v352_v8 }
 0x11d   : > { %v415_v14 = vsel %vm361_vm2, %v358_v9, 0  ;;  %v1352_v19 = vmul.u32.u64.low 3817748708, %v507_v0  ;;  %v1353_v20 = vmul.u32.u64.high 3817748708, %v507_v0, %v1352_v19  ;;  %vm510_vm4 = vcmp.lt.s32.totalorder %v507_v0, 288 }
 0x11f   : > { %v354_v10 = vpop.permute.xlu0 %353  ;;  %v356_v11 = vpop.permute.xlu1 %355  ;;  %v539_v26 = vshrl.u32 %v1353_v20, 4 }
 0x120   : > { %v359_v12 = vsel %vm357_vm9, %v352_v8, %v354_v10  ;;  %v360_v13 = vsel %vm357_vm9, %v354_v10, %v356_v11 }
 0x121   : > { %765 = vmatprep.subr.msk.bf16.mxu0 %vm361_vm2, %v359_v12  ;;  %v421_v15 = vsel %vm361_vm2, %v360_v13, 0  ;;  %v540_v28 = vmul.u32 18, %v539_v26  ;;  %vm550_vm2 = vmand %vm547_vm14, %vm544_vm13 }
 0x122   : > { %432 = vmatpush1.bf16.msra.mxu0 %v415_v14  ;;  %787 = vmatpush3.bf16.msra.mxu1 %v421_v15  ;;  %v556_v39 = vsel %vm550_vm2, %v553_v36, %v519_v33 }
 0x123   : > { %v541_v31 = vsub.s32 %v507_v0, %v540_v28  ;;  %vm559_vm6 = vcmp.lt.s32.totalorder %v556_v39, 16 }
 0x125   : > { %766 = vmatmul.mubr.msk.bf16.vlgmr.msra.gmra.mrb[0].mxu0 %vm410_vm10, %v241_v16  ;;  %789 = vmatmul.mubr.msk.bf16.vlgmr.msra.gmra.mrb[0].mxu1 %vm410_vm10, %v241_v16  ;;  %vm546_vm11 = vcmp.ne.s32.totalorder %v541_v31, 0  ;;  %vm549_vm12 = vcmp.lt.s32.totalorder %v541_v31, 0  ;;  %v555_v35 = vadd.s32 18, %v541_v31 }
 0x126   : > { %vm552_vm15 = vmand %vm549_vm12, %vm546_vm11 }
 0x127   : > { %v558_v37 = vsel %vm552_vm15, %v555_v35, %v541_v31 }
 0x128   : > { %vm561_vm5 = vcmp.lt.s32.totalorder %v558_v37, 16 }
 0x129   : > { %vm564_vm7 = vmand %vm510_vm4, %vm561_vm5 }
 0x1f8   : > { %v457_v41 = vpop.f32.mrb[0].mxu0  ;;  %v498_v42 = vpop.f32.mrb[0].mxu1 }
 0x1f9   : > { %v571_v43 = vsel %vm559_vm6, %v457_v41, 0.0  ;;  %v573_v44 = vsel %vm564_vm7, %v498_v42, 0.0  ;;  %v459_v45 = vpop.f32.mrb[1].mxu0  ;;  %v790_v46 = vpop.f32.mrb[1].mxu1 }
 0x1fa   : > { %v579_v47 = vmul.f32 %v571_v43, %v571_v43  ;;  %v572_v48 = vsel %vm560_vm8, %v459_v45, 0.0  ;;  %v461_v49 = vpop.f32.mrb[2].mxu0  ;;  %v501_v50 = vpop.f32.mrb[2].mxu1  ;;  %v581_v51 = vmul.f32 %v573_v44, %v573_v44 }
 0x1fb   : > { %v574_v52 = vadd.f32 %v572_v48, %v571_v43  ;;  %v580_v53 = vmul.f32 %v572_v48, %v572_v48  ;;  %v462_v54 = vpop.f32.mrb[3].mxu0  ;;  %v791_v55 = vpop.f32.mrb[3].mxu1 }
 0x1fd   : > { %v575_v56 = vadd.f32 %v574_v52, %v573_v44  ;;  %v582_v57 = vadd.f32 %v580_v53, %v579_v47 }
 0x1ff   : > { %576 = vadd.xlane.f32.xlu0 %v575_v56  ;;  %v583_v58 = vadd.f32 %v582_v57, %v581_v51 }
 0x201   : > { %584 = vadd.xlane.f32.xlu1 %v583_v58 }
 0x28c   : > { %v577_v60 = vpop.xlane.xlu0 %576 }
 0x28d   : > { %v578_v61 = vmul.f32 0.00390625, %v577_v60 }
 0x28e   : > { %v585_v62 = vpop.xlane.xlu1 %584 }
 0x28f   : > { %v587_v63 = vmul.f32 %v578_v61, %v578_v61  ;;  %v586_v1 = vmul.f32 0.00390625, %v585_v62 }
 0x291   : > { %v588_v2 = vsub.f32 %v586_v1, %v587_v63 }
 0x293   : > { %v589_v3 = vmax.f32 %v588_v2, 0.0 }
 0x295   : > { %v590_v4 = vadd.f32 1e-05, %v589_v3 }
 0x297   : > { %904 = vrsqrt.f32 %v590_v4 }
 0x2a1   : > { %v905_v7 = vpop.eup %904 }
 0x2a2   : > { %v592_v8 = vmul.f32 %v905_v7, %v242_v6 }
 0x2a4   : > { %601 = vperm.xlu1 %897, %v592_v8   ;;  %v593_v9 = vmul.f32 %v592_v8, %v578_v61 }
 0x2a6   : > { %595 = vrot.lane.b32.xlu0 %v593_v9, %s1096_s19 }
 0x318   : > { %v596_v10 = vpop.permute.xlu0 %595 }
 0x319   : > { %v598_v11 = vsub.f32 %v242_v6, %v596_v10 }
 0x31b   : > { %609 = vperm.xlu0 %898, %v598_v11  }
 0x323   : > { %v602_v12 = vpop.permute.xlu1 %601 }
 0x324   : > { %v604_v13 = vmul.f32 %v602_v12, %v457_v41  ;;  %v605_v14 = vmul.f32 %v602_v12, %v459_v45  ;;  %v606_v15 = vmul.f32 %v602_v12, %v498_v42 }
 0x39a   : > { %v610_v16 = vpop.permute.xlu0 %609 }
 0x39b   : > { %v612_v17 = vadd.f32 %v610_v16, %v604_v13  ;;  %v613_v18 = vadd.f32 %v610_v16, %v605_v14  ;;  %v614_v0 = vadd.f32 %v610_v16, %v606_v15 }
 0x39d   : > { %v615_v19 = vmul.f32 0.2, %v612_v17  ;;  %v616_v20 = vmul.f32 0.2, %v613_v18  ;;  %v617_v21 = vmul.f32 0.2, %v614_v0 }
 0x39f   : > { %v618_v22 = vmax.f32 %v612_v17, %v615_v19  ;;  %v619_v23 = vmax.f32 %v613_v18, %v616_v20  ;;  %v620_v24 = vmax.f32 %v614_v0, %v617_v21 }
 0x3a1   : > { %621 = vst [vmem:[%s239_s30] sm:$0xff] %v618_v22  ;;  %622 = vst [vmem:[%s239_s30 + $0x8] sm:$0xff] %v619_v23 }
 0x3a2   : > { %623 = vst [vmem:[%s239_s30 + $0x10] sm:$0xff] %v620_v24 }
 0x3a3   : > { %1005 = shalt.err (!%p1002_p5)
}
 0x3a4   : > { %s1006_s7 = scalar_lea.hbm %s1369_s11, 384  ;;  %s1010_s26 = scalar_lea.hbm %s1421_s3, 768 }
 0x3a5   : > { %p1007_p10 = scmp.ne.s32.totalorder %s1369_s11, %s1006_s7  ;;  %p1011_p7 = scmp.lt.u32.totalorder %s1369_s11, %s1421_s3 }
 0x3a6   : > { %p1012_p3 = scmp.lt.u32.totalorder %s1010_s26, %s1006_s7  ;;  %p1014_p1 = scmp.lt.u32.totalorder %s1006_s7, %s1369_s11 }
 0x3a7   : > { %p1008_p13 = pnand %p1007_p10, %p1244_p8 }
 0x3a8   : > { %p1013_p11 = por %p1012_p3, %p1011_p7 }
 0x3a9   : > { %p1009_p9 = pneg %p1008_p13 }
 0x3aa   : > { %p1015_p4 = por %p1014_p1, %p1013_p11 }
 0x3ac   : > { %p1016_p2 = pnand %p1015_p4, %p1009_p9 }
 0x3ae   : > { %1019 = shalt.err (!%p1016_p2)
}
 0x3af   : > { %810 = dma.vmem_to_hbm [thread:$0]  (%p1244_p8), %s1371_s21, 384, %s1369_s11, %s625_s15  }
 0x3b0 PF: > { %s653_s18 = sand.u32 1, %s1058_s12   ;;  %p1438_p6 = scmp.ne.s32.totalorder %s1429_s23, 0 }
 0x3b1   : > { %p1439_p12 = scmp.ge.s32.totalorder %s1078_s17, 2  ;;  %s654_s27 = scalar_lea.sflag [#allocation4], %s653_s18 }
 0x3b3   : > { %p824_p0 = pnand %p1439_p12, %p1438_p6 }
 0x3b5   : > { %1053 = dma.done.wait (!%p824_p0), %s654_s27, 384  }
 0x3b6   : > { %1055 = vsyncadd (!%p824_p0), %s654_s27, 4294966912  ;;  %s20_s17 = sadd.s32 1, %s1078_s17   ;;  %s1440_s12 = smov %s1062_s13 }
 0x3b7   : > { %p17_p5 = scmp.ge.s32.totalorder %s20_s17, 4   ;;  %s1441_s13 = smov %s1066_s14 }
 0x3b8   : > { %s1442_s14 = smov %s1253_s25  ;;  %s1443_s15 = smov %s1074_s16 }
 0x3b9   : > { %s1444_s16 = smov %s1446_s9  ;;  %19 = sbr.rel (!%p17_p5) target bundleno = 7 (0x7), region = 87 }
 0x3c0   :  { %659 = vsyncpa [#allocation3], 1 }
 0x3c1   :  { %661 = vsyncpa [#allocation3 + $0x1], 1 }
 0x3c2   :  { %662 = vsyncpa [#allocation6], 1 }
 0x3c3   :  { %663 = vsyncpa [#allocation4], 1 }
 0x3c4   :  { %665 = vsyncpa [#allocation4 + $0x1], 1 }

</bundles_post_ra>
